<compile_context>
chip_gen: v7x
topology: tpu7x:2x2x1
jax: 0.10.0
libtpu: 0.0.40
codegen_flags: <defaults>
</compile_context>

<pallas_src>
import functools
import inspect

import jax
import jax.numpy as jnp
from jax.experimental import pallas as pl
from jax.experimental.pallas import tpu as pltpu


_INV_SQRT2 = 0.7071067811865476
_LN_EPS = 1e-5  # torch.nn.LayerNorm default


def _round_up(x, m):
    return (x + m - 1) // m * m


def _cdiv(a, b):
    return (a + b - 1) // b


# ---------------------------------------------------------------------------
# hardware introspection (generation-aware VMEM budget / tile defaults)
# ---------------------------------------------------------------------------
def _device_kind():
    try:
        return jax.devices()[0].device_kind.lower()
    except Exception:
        return ""


def _vmem_capacity_bytes():
    try:
        info = pltpu.get_tpu_info()
        cap = getattr(info, "vmem_capacity_bytes", None)
        if cap:
            return int(cap)
    except Exception:
        pass
    kind = _device_kind()
    if "v5" in kind or "v6" in kind:
        return 128 * 1024 * 1024
    return 64 * 1024 * 1024  # v7x / unknown -> conservative


def _is_v5e():
    kind = _device_kind()
    return "v5" in kind and ("lite" in kind or "5e" in kind)


def _supports_single_buffering():
    # Explicit feature detection (review: no blind try/except around the compile).
    if not hasattr(pl, "Buffered"):
        return False
    try:
        return "pipeline_mode" in inspect.signature(pl.BlockSpec).parameters
    except (TypeError, ValueError):
        return False


# ---------------------------------------------------------------------------
# math helpers (run in-kernel, all f32 -> safe on v5e's f32-only VPU/EUP)
# ---------------------------------------------------------------------------
def _gelu_exact(x):
    # torch.nn.GELU() default = exact erf-based GELU
    return 0.5 * x * (1.0 + jax.lax.erf(x * _INV_SQRT2))


def _gelu_tanh(x):
    # optional fast path (EUP tanh); NOT the default (keeps torch parity)
    c = 0.7978845608028654
    return 0.5 * x * (1.0 + jnp.tanh(c * (x + 0.044715 * x * x * x)))


def _layernorm(x, gamma, beta, eps=_LN_EPS):
    # (x - mu) computed once and reused for both the variance reduction and the
    # normalized output (review: fuse the LayerNorm passes).
    mu = jnp.mean(x, axis=-1, keepdims=True)
    xc = x - mu
    var = jnp.mean(xc * xc, axis=-1, keepdims=True)
    return xc * jax.lax.rsqrt(var + eps) * gamma + beta


# ---------------------------------------------------------------------------
# resident-weight kernel (all weights live in VMEM for the whole grid)
# ---------------------------------------------------------------------------
def _fused_head_kernel(x_ref, ln1_w_ref, ln1_b_ref, w1_ref, b1_ref,
                       ln2_w_ref, ln2_b_ref, w2_ref, b2_ref, w3_ref, b3_ref,
                       out_ref, *, gelu_fn):
    bm = x_ref.shape[0]
    n_sub = 2 if bm % 16 == 0 else 1     # two independent row chains -> MXU/VPU overlap
    sub = bm // n_sub

    # hoist replicated params / weights once per batch block
    g1, be1 = ln1_w_ref[...], ln1_b_ref[...]
    g2, be2 = ln2_w_ref[...], ln2_b_ref[...]
    b1, b2, b3 = b1_ref[...], b2_ref[...], b3_ref[...]
    w1, w2, w3 = w1_ref[...], w2_ref[...], w3_ref[...]

    for s in range(n_sub):               # static unroll: the chains are independent
        rows = pl.ds(s * sub, sub)
        x = _layernorm(x_ref[rows, :].astype(jnp.float32), g1, be1)
        h = jnp.dot(x.astype(jnp.bfloat16), w1, preferred_element_type=jnp.float32) + b1
        h = gelu_fn(h)                    # dropout1: identity in eval
        h = _layernorm(h, g2, be2)
        h = jnp.dot(h.astype(jnp.bfloat16), w2, preferred_element_type=jnp.float32) + b2
        h = gelu_fn(h)                    # dropout2: identity in eval
        logits = jnp.dot(h.astype(jnp.bfloat16), w3, preferred_element_type=jnp.float32) + b3
        out_ref[rows, :] = logits.astype(out_ref.dtype)


# ---------------------------------------------------------------------------
# streaming kernel (v7x VMEM guard): w1 / w2 tiles streamed over a 2nd grid axis.
#   phase 0 (k in [0, nk)):  LN1 once, dense1 N-tile + GELU, stash h in VMEM
#   phase 1 (k in [nk, 2nk)): LN2 stats once over full h, dense2 K-tile accumulate;
#                             at the last step: GELU, out_proj, store.
# Numerics are identical to the fused path (full-row LN stats, f32 accumulation).
# ---------------------------------------------------------------------------
def _make_streaming_kernel(nk, ti, gelu_fn):
    def kernel(x_ref, ln1_w_ref, ln1_b_ref, w1_ref, b1_ref,
               ln2_w_ref, ln2_b_ref, w2_ref, b2_ref, w3_ref, b3_ref,
               out_ref, xln_ref, h_ref, mu_ref, rs_ref, acc2_ref):
        k = pl.program_id(1)

        @pl.when(k < nk)
        def _phase0():
            @pl.when(k == 0)
            def _():
                xln = _layernorm(x_ref[...].astype(jnp.float32),
                                 ln1_w_ref[...], ln1_b_ref[...])
                xln_ref[...] = xln.astype(jnp.bfloat16)

            col = pl.multiple_of(k * ti, ti)
            h_k = jnp.dot(xln_ref[...], w1_ref[...],
                          preferred_element_type=jnp.float32)
            h_k = gelu_fn(h_k + b1_ref[:, pl.ds(col, ti)])   # dropout1: identity
            h_ref[:, pl.ds(col, ti)] = h_k

        @pl.when(k >= nk)
        def _phase1():
            @pl.when(k == nk)
            def _():
                h = h_ref[...]
                mu = jnp.mean(h, axis=-1, keepdims=True)
                xc = h - mu
                var = jnp.mean(xc * xc, axis=-1, keepdims=True)
                mu_ref[...] = mu
                rs_ref[...] = jax.lax.rsqrt(var + _LN_EPS)
                acc2_ref[...] = jnp.zeros_like(acc2_ref)

            kk = k - nk
            col = pl.multiple_of(kk * ti, ti)
            hn = (h_ref[:, pl.ds(col, ti)] - mu_ref[...]) * rs_ref[...]
            hn = hn * ln2_w_ref[:, pl.ds(col, ti)] + ln2_b_ref[:, pl.ds(col, ti)]
            acc2_ref[...] += jnp.dot(hn.astype(jnp.bfloat16), w2_ref[...],
                                     preferred_element_type=jnp.float32)

            @pl.when(k == 2 * nk - 1)
            def _():
                g = gelu_fn(acc2_ref[...] + b2_ref[...])       # dropout2: identity
                logits = jnp.dot(g.astype(jnp.bfloat16), w3_ref[...],
                                 preferred_element_type=jnp.float32) + b3_ref[...]
                out_ref[...] = logits.astype(out_ref.dtype)

    return kernel


# ---------------------------------------------------------------------------
# one-time parameter preparation (review: hoist bf16 casts / lane padding)
# ---------------------------------------------------------------------------
def prepare_params(params):
    if params.get("_prepared", False):
        return params
    num_labels = params["w3"].shape[-1]
    n_pad = _round_up(num_labels, 128)
    w3 = params["w3"]
    b3 = params["b3"].reshape(1, -1)
    if n_pad != num_labels:
        w3 = jnp.pad(w3, ((0, 0), (0, n_pad - num_labels)))
        b3 = jnp.pad(b3, ((0, 0), (0, n_pad - num_labels)))
    r = lambda a: a.reshape(1, -1).astype(jnp.float32)
    return {
        "_prepared": True,
        "num_labels": int(num_labels),
        "ln1_w": r(params["ln1_w"]), "ln1_b": r(params["ln1_b"]),
        "ln2_w": r(params["ln2_w"]), "ln2_b": r(params["ln2_b"]),
        "w1": params["w1"].astype(jnp.bfloat16), "b1": r(params["b1"]),
        "w2": params["w2"].astype(jnp.bfloat16), "b2": r(params["b2"]),
        "w3": w3.astype(jnp.bfloat16), "b3": b3.astype(jnp.float32),
    }


# ---------------------------------------------------------------------------
# wrapper
# ---------------------------------------------------------------------------
def expansion_classifier_head(features, params, *, bm=None, force_stream=False,
                              stream_ti=None, gelu="exact"):
    """features: [B, input_size] f32. Returns logits [B, num_labels] f32 (eval forward)."""
    p = prepare_params(params)
    gelu_fn = _gelu_exact if gelu == "exact" else _gelu_tanh

    B, input_size = features.shape
    intermediate = p["w1"].shape[1]
    hidden = p["w2"].shape[1]
    n_pad = p["w3"].shape[1]
    num_labels = p["num_labels"]

    vmem_cap = _vmem_capacity_bytes()
    single_buf = _supports_single_buffering()

    # batch tile: >= 2 grid steps so ("parallel",) fills both v7x TensorCores;
    # v5e prefers 128. No host-side batch pad: the last grid step is a partial
    # block (out-of-bounds rows are garbage on read and masked on writeback).
    if bm is None:
        cap = 128 if _is_v5e() else 256
        bm = max(8, min(cap, _round_up(_cdiv(B, 2), 8)))
    else:
        bm = max(8, _round_up(bm, 8))
    grid_b = _cdiv(B, bm)

    # VMEM budgeting (bf16 weights, f32 activations, double-buffered x/out tiles)
    wbytes = 2 * (input_size * intermediate + intermediate * hidden + hidden * n_pad)
    small = 4 * (2 * input_size + 3 * intermediate + hidden + n_pad)
    io = 2 * bm * input_size * 4 + 2 * bm * n_pad * 4
    act = 4 * bm * (input_size + intermediate + hidden + n_pad)
    wbuf = 1 if single_buf else 2
    resident_est = wbuf * wbytes + 2 * small + io + act

    # intermediate tile for the streaming fallback
    ti = stream_ti
    if ti is None:
        for cand in (512, 384, 256, 128):
            if intermediate % cand == 0:
                ti = cand
                break
    can_stream = (ti is not None) and (intermediate % ti == 0)
    use_stream = can_stream and (force_stream or resident_est > 0.70 * vmem_cap)

    cost = pl.CostEstimate(
        flops=2 * B * (input_size * intermediate + intermediate * hidden + hidden * n_pad),
        transcendentals=B * (intermediate + hidden),
        bytes_accessed=B * input_size * 4 + wbytes + small + B * n_pad * 4,
    )

    def rep_spec(shape, n_axes, single):
        imap = (lambda i: (0, 0)) if n_axes == 1 else (lambda b, k: (0, 0))
        if single and single_buf:
            # replicated weight: DMA'd once; single buffer halves its resident VMEM
            return pl.BlockSpec(shape, imap, pipeline_mode=pl.Buffered(1))
        return pl.BlockSpec(shape, imap)

    args = (features, p["ln1_w"], p["ln1_b"], p["w1"], p["b1"],
            p["ln2_w"], p["ln2_b"], p["w2"], p["b2"], p["w3"], p["b3"])

    if not use_stream:
        vmem_limit = int(min(0.80 * vmem_cap, max(2 * resident_est, 32 * 1024 * 1024)))

        def build(single_weights):
            return pl.pallas_call(
                functools.partial(_fused_head_kernel, gelu_fn=gelu_fn),
                out_shape=jax.ShapeDtypeStruct((B, n_pad), jnp.float32),
                grid_spec=pltpu.PrefetchScalarGridSpec(
                    num_scalar_prefetch=0,
                    grid=(grid_b,),
                    in_specs=[
                        pl.BlockSpec((bm, input_size), lambda i: (i, 0)),   # features
                        rep_spec((1, input_size), 1, False),                # ln1 gamma
                        rep_spec((1, input_size), 1, False),                # ln1 beta
                        rep_spec((input_size, intermediate), 1, single_weights),  # w1
                        rep_spec((1, intermediate), 1, False),              # b1
                        rep_spec((1, intermediate), 1, False),              # ln2 gamma
                        rep_spec((1, intermediate), 1, False),              # ln2 beta
                        rep_spec((intermediate, hidden), 1, single_weights),      # w2
                        rep_spec((1, hidden), 1, False),                    # b2
                        rep_spec((hidden, n_pad), 1, single_weights),       # w3 (lane-padded)
                        rep_spec((1, n_pad), 1, False),                     # b3 (lane-padded)
                    ],
                    out_specs=pl.BlockSpec((bm, n_pad), lambda i: (i, 0)),
                ),
                compiler_params=pltpu.CompilerParams(
                    dimension_semantics=("parallel",),
                    vmem_limit_bytes=vmem_limit,
                ),
                cost_estimate=cost,
            )

        if single_buf:
            try:
                out = build(True)(*args)
            except (pltpu.LoweringException, ValueError, NotImplementedError):
                # Narrow fallback: only plausible rejections of the optional
                # Buffered(1) request. Genuine problems re-raise from build(False).
                out = build(False)(*args)
        else:
            out = build(False)(*args)
        return out[:, :num_labels]

    # ---- streaming build (large weights / v7x VMEM guard) ----
    nk = intermediate // ti
    stream_est = (2 * 2 * (input_size * ti + ti * hidden)   # double-buffered w1/w2 tiles
                  + 2 * 2 * hidden * n_pad                  # resident w3
                  + 2 * small + io
                  + bm * input_size * 2                     # xln scratch (bf16)
                  + bm * intermediate * 4                   # h scratch (f32)
                  + bm * hidden * 4 + 8 * bm)               # acc2 + stats
    vmem_limit = int(min(0.80 * vmem_cap, max(2 * stream_est, 32 * 1024 * 1024)))

    def w1_map(b, k):
        return (0, jnp.where(k < nk, k, 0))

    def w2_map(b, k):
        return (jnp.where(k >= nk, k - nk, 0), 0)

    call = pl.pallas_call(
        _make_streaming_kernel(nk, ti, gelu_fn),
        out_shape=jax.ShapeDtypeStruct((B, n_pad), jnp.float32),
        grid_spec=pltpu.PrefetchScalarGridSpec(
            num_scalar_prefetch=0,
            grid=(grid_b, 2 * nk),
            in_specs=[
                pl.BlockSpec((bm, input_size), lambda b, k: (b, 0)),   # features (fetched once per b)
                rep_spec((1, input_size), 2, False),                   # ln1 gamma
                rep_spec((1, input_size), 2, False),                   # ln1 beta
                pl.BlockSpec((input_size, ti), w1_map),                # w1 tile (streamed, phase 0)
                rep_spec((1, intermediate), 2, False),                 # b1
                rep_spec((1, intermediate), 2, False),                 # ln2 gamma
                rep_spec((1, intermediate), 2, False),                 # ln2 beta
                pl.BlockSpec((ti, hidden), w2_map),                    # w2 tile (streamed, phase 1)
                rep_spec((1, hidden), 2, False),                       # b2
                rep_spec((hidden, n_pad), 2, False),                   # w3 (resident)
                rep_spec((1, n_pad), 2, False),                        # b3
            ],
            out_specs=pl.BlockSpec((bm, n_pad), lambda b, k: (b, 0)),
            scratch_shapes=[
                pltpu.VMEM((bm, input_size), jnp.bfloat16),    # LN1(x)
                pltpu.VMEM((bm, intermediate), jnp.float32),   # h = gelu(dense1)
                pltpu.VMEM((bm, 1), jnp.float32),              # LN2 mean
                pltpu.VMEM((bm, 1), jnp.float32),              # LN2 rstd
                pltpu.VMEM((bm, hidden), jnp.float32),         # dense2 accumulator
            ],
        ),
        compiler_params=pltpu.CompilerParams(
            dimension_semantics=("parallel", "arbitrary"),
            vmem_limit_bytes=vmem_limit,
        ),
        cost_estimate=cost,
    )
    out = call(*args)
    return out[:, :num_labels]


# ---------------------------------------------------------------------------
# demo / test
# ---------------------------------------------------------------------------
def init_params(key, input_size, hidden_size, num_labels):
    intermediate_size = hidden_size * 4
    k = jax.random.split(key, 8)
    scale = 0.02
    return {
        # LayerNorm params as (1, N) so they broadcast along TPU lanes; weights [in, out].
        "ln1_w": 1.0 + 0.1 * jax.random.normal(k[0], (1, input_size), jnp.float32),
        "ln1_b": 0.05 * jax.random.normal(k[1], (1, input_size), jnp.float32),
        "ln2_w": 1.0 + 0.1 * jax.random.normal(k[2], (1, intermediate_size), jnp.float32),
        "ln2_b": 0.05 * jax.random.normal(k[3], (1, intermediate_size), jnp.float32),
        "w1": scale * jax.random.normal(k[4], (input_size, intermediate_size), jnp.float32),
        "b1": 0.05 * jax.random.normal(k[5], (1, intermediate_size), jnp.float32),
        "w2": scale * jax.random.normal(k[6], (intermediate_size, hidden_size), jnp.float32),
        "b2": jnp.zeros((1, hidden_size), jnp.float32),
        "w3": scale * jax.random.normal(k[7], (hidden_size, num_labels), jnp.float32),
        "b3": jnp.zeros((1, num_labels), jnp.float32),
    }


def reference_forward(features, params):
    # Mirrors the kernel's numerics: bf16 matmul operands, f32 accumulation,
    # LayerNorm/GELU in f32.
    def mm(x, w, b):
        return jnp.dot(x.astype(jnp.bfloat16), w.astype(jnp.bfloat16),
                       preferred_element_type=jnp.float32) + b.reshape(1, -1)

    x = _layernorm(features.astype(jnp.float32),
                   params["ln1_w"].reshape(1, -1), params["ln1_b"].reshape(1, -1))
    x = _gelu_exact(mm(x, params["w1"], params["b1"]))
    x = _layernorm(x, params["ln2_w"].reshape(1, -1), params["ln2_b"].reshape(1, -1))
    x = _gelu_exact(mm(x, params["w2"], params["b2"]))
    return mm(x, params["w3"], params["b3"])


if __name__ == "__main__":
    # CLS + mean-pooled concat => input_size = 2 * hidden_size
    hidden_size = 64
    input_size = 2 * hidden_size   # 128
    num_labels = 4
    batch = 24                     # NOT a multiple of the tile -> exercises the ragged last block

    key = jax.random.PRNGKey(0)
    kx, kp = jax.random.split(key)
    features = jax.random.normal(kx, (batch, input_size), jnp.float32)
    params = init_params(kp, input_size, hidden_size, num_labels)
    prepared = prepare_params(params)   # one-time bf16 cast + lane padding (hoisted)

    ref = reference_forward(features, params)

    # Default (resident-weight) path: bm -> 16, grid=(2,) "parallel" batch tiles.
    logits = jax.block_until_ready(expansion_classifier_head(features, prepared))
    assert logits.shape == (batch, num_labels)
    err = float(jnp.max(jnp.abs(logits - ref)))
    assert jnp.allclose(logits, ref, atol=2e-3, rtol=2e-2), err

    # Forced streaming path (the large-weight / v7x VMEM-guard fallback), ti=128 -> nk=2.
    logits_s = jax.block_until_ready(
        expansion_classifier_head(features, prepared, force_stream=True, stream_ti=128))
    err_s = float(jnp.max(jnp.abs(logits_s - ref)))
    assert jnp.allclose(logits_s, ref, atol=2e-3, rtol=2e-2), err_s

    print("KERNEL_OK")
</pallas_src>

<mosaic_0001>
module attributes {stable_mosaic.version = 11 : i64} {
  func.func @_fused_head_kernel(%arg0: i32, %arg1: memref<16x128xf32, #tpu.memory_space<vmem>>, %arg2: memref<1x128xf32, #tpu.memory_space<vmem>>, %arg3: memref<1x128xf32, #tpu.memory_space<vmem>>, %arg4: memref<128x256xbf16, #tpu.memory_space<vmem>>, %arg5: memref<1x256xf32, #tpu.memory_space<vmem>>, %arg6: memref<1x256xf32, #tpu.memory_space<vmem>>, %arg7: memref<1x256xf32, #tpu.memory_space<vmem>>, %arg8: memref<256x64xbf16, #tpu.memory_space<vmem>>, %arg9: memref<1x64xf32, #tpu.memory_space<vmem>>, %arg10: memref<64x128xbf16, #tpu.memory_space<vmem>>, %arg11: memref<1x128xf32, #tpu.memory_space<vmem>>, %arg12: memref<16x128xf32, #tpu.memory_space<vmem>>) attributes {dimension_semantics = [#tpu.dimension_semantics<parallel>], iteration_bounds = array<i64: 2>, scalar_prefetch = 0 : i64, scratch_operands = 0 : i64, tpu.core_type = #tpu.core_type<tc>, window_params = [{transform_indices = @transform_0, window_bounds = array<i64: 16, 128>}, {pipeline_mode = #tpu.pipeline_mode<synchronous>, transform_indices = @transform_1, window_bounds = array<i64: 1, 128>}, {pipeline_mode = #tpu.pipeline_mode<synchronous>, transform_indices = @transform_2, window_bounds = array<i64: 1, 128>}, {pipeline_mode = #tpu.pipeline_mode<synchronous>, transform_indices = @transform_3, window_bounds = array<i64: 128, 256>}, {pipeline_mode = #tpu.pipeline_mode<synchronous>, transform_indices = @transform_4, window_bounds = array<i64: 1, 256>}, {pipeline_mode = #tpu.pipeline_mode<synchronous>, transform_indices = @transform_5, window_bounds = array<i64: 1, 256>}, {pipeline_mode = #tpu.pipeline_mode<synchronous>, transform_indices = @transform_6, window_bounds = array<i64: 1, 256>}, {pipeline_mode = #tpu.pipeline_mode<synchronous>, transform_indices = @transform_7, window_bounds = array<i64: 256, 64>}, {pipeline_mode = #tpu.pipeline_mode<synchronous>, transform_indices = @transform_8, window_bounds = array<i64: 1, 64>}, {pipeline_mode = #tpu.pipeline_mode<synchronous>, transform_indices = @transform_9, window_bounds = array<i64: 64, 128>}, {pipeline_mode = #tpu.pipeline_mode<synchronous>, transform_indices = @transform_10, window_bounds = array<i64: 1, 128>}, {transform_indices = @transform_11, window_bounds = array<i64: 16, 128>}]} {
    %c0 = arith.constant 0 : index
    %c0_0 = arith.constant 0 : index
    %0 = vector.load %arg2[%c0, %c0_0] : memref<1x128xf32, #tpu.memory_space<vmem>>, vector<1x128xf32>
    %c0_1 = arith.constant 0 : index
    %c0_2 = arith.constant 0 : index
    %1 = vector.load %arg3[%c0_1, %c0_2] : memref<1x128xf32, #tpu.memory_space<vmem>>, vector<1x128xf32>
    %c0_3 = arith.constant 0 : index
    %c0_4 = arith.constant 0 : index
    %2 = vector.load %arg6[%c0_3, %c0_4] : memref<1x256xf32, #tpu.memory_space<vmem>>, vector<1x256xf32>
    %c0_5 = arith.constant 0 : index
    %c0_6 = arith.constant 0 : index
    %3 = vector.load %arg7[%c0_5, %c0_6] : memref<1x256xf32, #tpu.memory_space<vmem>>, vector<1x256xf32>
    %c0_7 = arith.constant 0 : index
    %c0_8 = arith.constant 0 : index
    %4 = vector.load %arg5[%c0_7, %c0_8] : memref<1x256xf32, #tpu.memory_space<vmem>>, vector<1x256xf32>
    %c0_9 = arith.constant 0 : index
    %c0_10 = arith.constant 0 : index
    %5 = vector.load %arg9[%c0_9, %c0_10] : memref<1x64xf32, #tpu.memory_space<vmem>>, vector<1x64xf32>
    %c0_11 = arith.constant 0 : index
    %c0_12 = arith.constant 0 : index
    %6 = vector.load %arg11[%c0_11, %c0_12] : memref<1x128xf32, #tpu.memory_space<vmem>>, vector<1x128xf32>
    %c0_13 = arith.constant 0 : index
    %c0_14 = arith.constant 0 : index
    %7 = vector.load %arg4[%c0_13, %c0_14] : memref<128x256xbf16, #tpu.memory_space<vmem>>, vector<128x256xbf16>
    %c0_15 = arith.constant 0 : index
    %c0_16 = arith.constant 0 : index
    %8 = vector.load %arg8[%c0_15, %c0_16] : memref<256x64xbf16, #tpu.memory_space<vmem>>, vector<256x64xbf16>
    %c0_17 = arith.constant 0 : index
    %c0_18 = arith.constant 0 : index
    %9 = vector.load %arg10[%c0_17, %c0_18] : memref<64x128xbf16, #tpu.memory_space<vmem>>, vector<64x128xbf16>
    %c0_19 = arith.constant 0 : index
    %c0_20 = arith.constant 0 : index
    %10 = vector.load %arg1[%c0_19, %c0_20] : memref<16x128xf32, #tpu.memory_space<vmem>>, vector<8x128xf32>
    %cst = arith.constant dense<0.000000e+00> : vector<8xf32>
    %11 = vector.multi_reduction <add>, %10, %cst [1] : vector<8x128xf32> to vector<8xf32>
    %12 = vector.shape_cast %11 : vector<8xf32> to vector<8x1xf32>
    %cst_21 = arith.constant 1.280000e+02 : f32
    %13 = vector.broadcast %cst_21 : f32 to vector<8x1xf32>
    %14 = arith.divf %12, %13 : vector<8x1xf32>
    %15 = vector.broadcast %14 : vector<8x1xf32> to vector<8x128xf32>
    %16 = arith.subf %10, %15 : vector<8x128xf32>
    %17 = arith.mulf %16, %16 : vector<8x128xf32>
    %cst_22 = arith.constant dense<0.000000e+00> : vector<8xf32>
    %18 = vector.multi_reduction <add>, %17, %cst_22 [1] : vector<8x128xf32> to vector<8xf32>
    %19 = vector.shape_cast %18 : vector<8xf32> to vector<8x1xf32>
    %cst_23 = arith.constant 1.280000e+02 : f32
    %20 = vector.broadcast %cst_23 : f32 to vector<8x1xf32>
    %21 = arith.divf %19, %20 : vector<8x1xf32>
    %cst_24 = arith.constant 9.99999974E-6 : f32
    %22 = vector.broadcast %cst_24 : f32 to vector<8x1xf32>
    %23 = arith.addf %21, %22 : vector<8x1xf32>
    %24 = math.rsqrt %23 : vector<8x1xf32>
    %25 = vector.broadcast %24 : vector<8x1xf32> to vector<8x128xf32>
    %26 = arith.mulf %16, %25 : vector<8x128xf32>
    %27 = vector.broadcast %0 : vector<1x128xf32> to vector<8x128xf32>
    %28 = arith.mulf %26, %27 : vector<8x128xf32>
    %29 = vector.broadcast %1 : vector<1x128xf32> to vector<8x128xf32>
    %30 = arith.addf %28, %29 : vector<8x128xf32>
    %31 = arith.truncf %30 : vector<8x128xf32> to vector<8x128xbf16>
    %cst_25 = arith.constant dense<0.000000e+00> : vector<8x256xf32>
    %32 = tpu.matmul %31, %7, %cst_25 {dimension_numbers = #tpu.dot_dimension_numbers<[1], [0], [0], [1], [0, 0, 1, 1], [], []>} : vector<8x128xbf16>, vector<128x256xbf16>, vector<8x256xf32> -> vector<8x256xf32>
    %33 = vector.broadcast %4 : vector<1x256xf32> to vector<8x256xf32>
    %34 = arith.addf %32, %33 : vector<8x256xf32>
    %cst_26 = arith.constant 5.000000e-01 : f32
    %35 = vector.broadcast %cst_26 : f32 to vector<8x256xf32>
    %36 = arith.mulf %35, %34 : vector<8x256xf32>
    %cst_27 = arith.constant 0.707106769 : f32
    %37 = vector.broadcast %cst_27 : f32 to vector<8x256xf32>
    %38 = arith.mulf %34, %37 : vector<8x256xf32>
    %39 = math.erf %38 : vector<8x256xf32>
    %cst_28 = arith.constant 1.000000e+00 : f32
    %40 = vector.broadcast %cst_28 : f32 to vector<8x256xf32>
    %41 = arith.addf %40, %39 : vector<8x256xf32>
    %42 = arith.mulf %36, %41 : vector<8x256xf32>
    %cst_29 = arith.constant dense<0.000000e+00> : vector<8xf32>
    %43 = vector.multi_reduction <add>, %42, %cst_29 [1] : vector<8x256xf32> to vector<8xf32>
    %44 = vector.shape_cast %43 : vector<8xf32> to vector<8x1xf32>
    %cst_30 = arith.constant 2.560000e+02 : f32
    %45 = vector.broadcast %cst_30 : f32 to vector<8x1xf32>
    %46 = arith.divf %44, %45 : vector<8x1xf32>
    %47 = vector.broadcast %46 : vector<8x1xf32> to vector<8x256xf32>
    %48 = arith.subf %42, %47 : vector<8x256xf32>
    %49 = arith.mulf %48, %48 : vector<8x256xf32>
    %cst_31 = arith.constant dense<0.000000e+00> : vector<8xf32>
    %50 = vector.multi_reduction <add>, %49, %cst_31 [1] : vector<8x256xf32> to vector<8xf32>
    %51 = vector.shape_cast %50 : vector<8xf32> to vector<8x1xf32>
    %cst_32 = arith.constant 2.560000e+02 : f32
    %52 = vector.broadcast %cst_32 : f32 to vector<8x1xf32>
    %53 = arith.divf %51, %52 : vector<8x1xf32>
    %cst_33 = arith.constant 9.99999974E-6 : f32
    %54 = vector.broadcast %cst_33 : f32 to vector<8x1xf32>
    %55 = arith.addf %53, %54 : vector<8x1xf32>
    %56 = math.rsqrt %55 : vector<8x1xf32>
    %57 = vector.broadcast %56 : vector<8x1xf32> to vector<8x256xf32>
    %58 = arith.mulf %48, %57 : vector<8x256xf32>
    %59 = vector.broadcast %2 : vector<1x256xf32> to vector<8x256xf32>
    %60 = arith.mulf %58, %59 : vector<8x256xf32>
    %61 = vector.broadcast %3 : vector<1x256xf32> to vector<8x256xf32>
    %62 = arith.addf %60, %61 : vector<8x256xf32>
    %63 = arith.truncf %62 : vector<8x256xf32> to vector<8x256xbf16>
    %cst_34 = arith.constant dense<0.000000e+00> : vector<8x64xf32>
    %64 = tpu.matmul %63, %8, %cst_34 {dimension_numbers = #tpu.dot_dimension_numbers<[1], [0], [0], [1], [0, 0, 1, 1], [], []>} : vector<8x256xbf16>, vector<256x64xbf16>, vector<8x64xf32> -> vector<8x64xf32>
    %65 = vector.broadcast %5 : vector<1x64xf32> to vector<8x64xf32>
    %66 = arith.addf %64, %65 : vector<8x64xf32>
    %cst_35 = arith.constant 5.000000e-01 : f32
    %67 = vector.broadcast %cst_35 : f32 to vector<8x64xf32>
    %68 = arith.mulf %67, %66 : vector<8x64xf32>
    %cst_36 = arith.constant 0.707106769 : f32
    %69 = vector.broadcast %cst_36 : f32 to vector<8x64xf32>
    %70 = arith.mulf %66, %69 : vector<8x64xf32>
    %71 = math.erf %70 : vector<8x64xf32>
    %cst_37 = arith.constant 1.000000e+00 : f32
    %72 = vector.broadcast %cst_37 : f32 to vector<8x64xf32>
    %73 = arith.addf %72, %71 : vector<8x64xf32>
    %74 = arith.mulf %68, %73 : vector<8x64xf32>
    %75 = arith.truncf %74 : vector<8x64xf32> to vector<8x64xbf16>
    %cst_38 = arith.constant dense<0.000000e+00> : vector<8x128xf32>
    %76 = tpu.matmul %75, %9, %cst_38 {dimension_numbers = #tpu.dot_dimension_numbers<[1], [0], [0], [1], [0, 0, 1, 1], [], []>} : vector<8x64xbf16>, vector<64x128xbf16>, vector<8x128xf32> -> vector<8x128xf32>
    %77 = vector.broadcast %6 : vector<1x128xf32> to vector<8x128xf32>
    %78 = arith.addf %76, %77 : vector<8x128xf32>
    %c0_39 = arith.constant 0 : index
    %c0_40 = arith.constant 0 : index
    %79 = vector.load %arg12[%c0_39, %c0_40] : memref<16x128xf32, #tpu.memory_space<vmem>>, vector<8x128xf32>
    tpu.vector_store %arg12[%c0_39, %c0_40], %78 {strides = array<i32>} : memref<16x128xf32, #tpu.memory_space<vmem>>, vector<8x128xf32>,
    %c8 = arith.constant 8 : index
    %c0_41 = arith.constant 0 : index
    %80 = vector.load %arg1[%c8, %c0_41] : memref<16x128xf32, #tpu.memory_space<vmem>>, vector<8x128xf32>
    %cst_42 = arith.constant dense<0.000000e+00> : vector<8xf32>
    %81 = vector.multi_reduction <add>, %80, %cst_42 [1] : vector<8x128xf32> to vector<8xf32>
    %82 = vector.shape_cast %81 : vector<8xf32> to vector<8x1xf32>
    %cst_43 = arith.constant 1.280000e+02 : f32
    %83 = vector.broadcast %cst_43 : f32 to vector<8x1xf32>
    %84 = arith.divf %82, %83 : vector<8x1xf32>
    %85 = vector.broadcast %84 : vector<8x1xf32> to vector<8x128xf32>
    %86 = arith.subf %80, %85 : vector<8x128xf32>
    %87 = arith.mulf %86, %86 : vector<8x128xf32>
    %cst_44 = arith.constant dense<0.000000e+00> : vector<8xf32>
    %88 = vector.multi_reduction <add>, %87, %cst_44 [1] : vector<8x128xf32> to vector<8xf32>
    %89 = vector.shape_cast %88 : vector<8xf32> to vector<8x1xf32>
    %cst_45 = arith.constant 1.280000e+02 : f32
    %90 = vector.broadcast %cst_45 : f32 to vector<8x1xf32>
    %91 = arith.divf %89, %90 : vector<8x1xf32>
    %cst_46 = arith.constant 9.99999974E-6 : f32
    %92 = vector.broadcast %cst_46 : f32 to vector<8x1xf32>
    %93 = arith.addf %91, %92 : vector<8x1xf32>
    %94 = math.rsqrt %93 : vector<8x1xf32>
    %95 = vector.broadcast %94 : vector<8x1xf32> to vector<8x128xf32>
    %96 = arith.mulf %86, %95 : vector<8x128xf32>
    %97 = vector.broadcast %0 : vector<1x128xf32> to vector<8x128xf32>
    %98 = arith.mulf %96, %97 : vector<8x128xf32>
    %99 = vector.broadcast %1 : vector<1x128xf32> to vector<8x128xf32>
    %100 = arith.addf %98, %99 : vector<8x128xf32>
    %101 = arith.truncf %100 : vector<8x128xf32> to vector<8x128xbf16>
    %cst_47 = arith.constant dense<0.000000e+00> : vector<8x256xf32>
    %102 = tpu.matmul %101, %7, %cst_47 {dimension_numbers = #tpu.dot_dimension_numbers<[1], [0], [0], [1], [0, 0, 1, 1], [], []>} : vector<8x128xbf16>, vector<128x256xbf16>, vector<8x256xf32> -> vector<8x256xf32>
    %103 = vector.broadcast %4 : vector<1x256xf32> to vector<8x256xf32>
    %104 = arith.addf %102, %103 : vector<8x256xf32>
    %cst_48 = arith.constant 5.000000e-01 : f32
    %105 = vector.broadcast %cst_48 : f32 to vector<8x256xf32>
    %106 = arith.mulf %105, %104 : vector<8x256xf32>
    %cst_49 = arith.constant 0.707106769 : f32
    %107 = vector.broadcast %cst_49 : f32 to vector<8x256xf32>
    %108 = arith.mulf %104, %107 : vector<8x256xf32>
    %109 = math.erf %108 : vector<8x256xf32>
    %cst_50 = arith.constant 1.000000e+00 : f32
    %110 = vector.broadcast %cst_50 : f32 to vector<8x256xf32>
    %111 = arith.addf %110, %109 : vector<8x256xf32>
    %112 = arith.mulf %106, %111 : vector<8x256xf32>
    %cst_51 = arith.constant dense<0.000000e+00> : vector<8xf32>
    %113 = vector.multi_reduction <add>, %112, %cst_51 [1] : vector<8x256xf32> to vector<8xf32>
    %114 = vector.shape_cast %113 : vector<8xf32> to vector<8x1xf32>
    %cst_52 = arith.constant 2.560000e+02 : f32
    %115 = vector.broadcast %cst_52 : f32 to vector<8x1xf32>
    %116 = arith.divf %114, %115 : vector<8x1xf32>
    %117 = vector.broadcast %116 : vector<8x1xf32> to vector<8x256xf32>
    %118 = arith.subf %112, %117 : vector<8x256xf32>
    %119 = arith.mulf %118, %118 : vector<8x256xf32>
    %cst_53 = arith.constant dense<0.000000e+00> : vector<8xf32>
    %120 = vector.multi_reduction <add>, %119, %cst_53 [1] : vector<8x256xf32> to vector<8xf32>
    %121 = vector.shape_cast %120 : vector<8xf32> to vector<8x1xf32>
    %cst_54 = arith.constant 2.560000e+02 : f32
    %122 = vector.broadcast %cst_54 : f32 to vector<8x1xf32>
    %123 = arith.divf %121, %122 : vector<8x1xf32>
    %cst_55 = arith.constant 9.99999974E-6 : f32
    %124 = vector.broadcast %cst_55 : f32 to vector<8x1xf32>
    %125 = arith.addf %123, %124 : vector<8x1xf32>
    %126 = math.rsqrt %125 : vector<8x1xf32>
    %127 = vector.broadcast %126 : vector<8x1xf32> to vector<8x256xf32>
    %128 = arith.mulf %118, %127 : vector<8x256xf32>
    %129 = vector.broadcast %2 : vector<1x256xf32> to vector<8x256xf32>
    %130 = arith.mulf %128, %129 : vector<8x256xf32>
    %131 = vector.broadcast %3 : vector<1x256xf32> to vector<8x256xf32>
    %132 = arith.addf %130, %131 : vector<8x256xf32>
    %133 = arith.truncf %132 : vector<8x256xf32> to vector<8x256xbf16>
    %cst_56 = arith.constant dense<0.000000e+00> : vector<8x64xf32>
    %134 = tpu.matmul %133, %8, %cst_56 {dimension_numbers = #tpu.dot_dimension_numbers<[1], [0], [0], [1], [0, 0, 1, 1], [], []>} : vector<8x256xbf16>, vector<256x64xbf16>, vector<8x64xf32> -> vector<8x64xf32>
    %135 = vector.broadcast %5 : vector<1x64xf32> to vector<8x64xf32>
    %136 = arith.addf %134, %135 : vector<8x64xf32>
    %cst_57 = arith.constant 5.000000e-01 : f32
    %137 = vector.broadcast %cst_57 : f32 to vector<8x64xf32>
    %138 = arith.mulf %137, %136 : vector<8x64xf32>
    %cst_58 = arith.constant 0.707106769 : f32
    %139 = vector.broadcast %cst_58 : f32 to vector<8x64xf32>
    %140 = arith.mulf %136, %139 : vector<8x64xf32>
    %141 = math.erf %140 : vector<8x64xf32>
    %cst_59 = arith.constant 1.000000e+00 : f32
    %142 = vector.broadcast %cst_59 : f32 to vector<8x64xf32>
    %143 = arith.addf %142, %141 : vector<8x64xf32>
    %144 = arith.mulf %138, %143 : vector<8x64xf32>
    %145 = arith.truncf %144 : vector<8x64xf32> to vector<8x64xbf16>
    %cst_60 = arith.constant dense<0.000000e+00> : vector<8x128xf32>
    %146 = tpu.matmul %145, %9, %cst_60 {dimension_numbers = #tpu.dot_dimension_numbers<[1], [0], [0], [1], [0, 0, 1, 1], [], []>} : vector<8x64xbf16>, vector<64x128xbf16>, vector<8x128xf32> -> vector<8x128xf32>
    %147 = vector.broadcast %6 : vector<1x128xf32> to vector<8x128xf32>
    %148 = arith.addf %146, %147 : vector<8x128xf32>
    %c8_61 = arith.constant 8 : index
    %c0_62 = arith.constant 0 : index
    %149 = vector.load %arg12[%c8_61, %c0_62] : memref<16x128xf32, #tpu.memory_space<vmem>>, vector<8x128xf32>
    tpu.vector_store %arg12[%c8_61, %c0_62], %148 {strides = array<i32>} : memref<16x128xf32, #tpu.memory_space<vmem>>, vector<8x128xf32>,
    return
  }
  func.func @transform_0(%arg0: i32) -> (i32, i32) {
    %c0_i32 = arith.constant 0 : i32
    %c0_i32_0 = arith.constant 0 : i32
    return %arg0, %c0_i32 : i32, i32
  }
  func.func @transform_1(%arg0: i32) -> (i32, i32) {
    %c0_i32 = arith.constant 0 : i32
    %c0_i32_0 = arith.constant 0 : i32
    %c0_i32_1 = arith.constant 0 : i32
    return %c0_i32, %c0_i32_0 : i32, i32
  }
  func.func @transform_2(%arg0: i32) -> (i32, i32) {
    %c0_i32 = arith.constant 0 : i32
    %c0_i32_0 = arith.constant 0 : i32
    %c0_i32_1 = arith.constant 0 : i32
    return %c0_i32, %c0_i32_0 : i32, i32
  }
  func.func @transform_3(%arg0: i32) -> (i32, i32) {
    %c0_i32 = arith.constant 0 : i32
    %c0_i32_0 = arith.constant 0 : i32
    %c0_i32_1 = arith.constant 0 : i32
    return %c0_i32, %c0_i32_0 : i32, i32
  }
  func.func @transform_4(%arg0: i32) -> (i32, i32) {
    %c0_i32 = arith.constant 0 : i32
    %c0_i32_0 = arith.constant 0 : i32
    %c0_i32_1 = arith.constant 0 : i32
    return %c0_i32, %c0_i32_0 : i32, i32
  }
  func.func @transform_5(%arg0: i32) -> (i32, i32) {
    %c0_i32 = arith.constant 0 : i32
    %c0_i32_0 = arith.constant 0 : i32
    %c0_i32_1 = arith.constant 0 : i32
    return %c0_i32, %c0_i32_0 : i32, i32
  }
  func.func @transform_6(%arg0: i32) -> (i32, i32) {
    %c0_i32 = arith.constant 0 : i32
    %c0_i32_0 = arith.constant 0 : i32
    %c0_i32_1 = arith.constant 0 : i32
    return %c0_i32, %c0_i32_0 : i32, i32
  }
  func.func @transform_7(%arg0: i32) -> (i32, i32) {
    %c0_i32 = arith.constant 0 : i32
    %c0_i32_0 = arith.constant 0 : i32
    %c0_i32_1 = arith.constant 0 : i32
    return %c0_i32, %c0_i32_0 : i32, i32
  }
  func.func @transform_8(%arg0: i32) -> (i32, i32) {
    %c0_i32 = arith.constant 0 : i32
    %c0_i32_0 = arith.constant 0 : i32
    %c0_i32_1 = arith.constant 0 : i32
    return %c0_i32, %c0_i32_0 : i32, i32
  }
  func.func @transform_9(%arg0: i32) -> (i32, i32) {
    %c0_i32 = arith.constant 0 : i32
    %c0_i32_0 = arith.constant 0 : i32
    %c0_i32_1 = arith.constant 0 : i32
    return %c0_i32, %c0_i32_0 : i32, i32
  }
  func.func @transform_10(%arg0: i32) -> (i32, i32) {
    %c0_i32 = arith.constant 0 : i32
    %c0_i32_0 = arith.constant 0 : i32
    %c0_i32_1 = arith.constant 0 : i32
    return %c0_i32, %c0_i32_0 : i32, i32
  }
  func.func @transform_11(%arg0: i32) -> (i32, i32) {
    %c0_i32 = arith.constant 0 : i32
    %c0_i32_0 = arith.constant 0 : i32
    return %arg0, %c0_i32 : i32, i32
  }
}

</mosaic_0001>

<bundles_post_ra>
// kernel: tpu_custom_call.1
= control target key start
LH: loop header
LB: loop body
LE: loop exit
PB: predicated region body
PF: predicated region fallthrough
CT: control target
= control target key end

     0   :  { %16 = vsyncpa [#allocation3], 0  ;;  %s1990_s0 = inlined_call_operand.vmem [shape: f32[24,128], index: 0, kind: input, shape index: {}]   ;;  %s1991_s1 = inlined_call_operand.vmem [shape: f32[1,128], index: 1, kind: input, shape index: {}]   ;;  %s1992_s2 = inlined_call_operand.vmem [shape: f32[1,128], index: 2, kind: input, shape index: {}]   ;;  %s1993_s3 = inlined_call_operand.vmem [shape: bf16[128,256], index: 3, kind: input, shape index: {}]   ;;  %s1994_s4 = inlined_call_operand.vmem [shape: f32[1,256], index: 4, kind: input, shape index: {}]   ;;  %s1995_s5 = inlined_call_operand.vmem [shape: f32[1,256], index: 5, kind: input, shape index: {}]   ;;  %s1996_s6 = inlined_call_operand.vmem [shape: f32[1,256], index: 6, kind: input, shape index: {}]   ;;  %s1997_s7 = inlined_call_operand.vmem [shape: bf16[256,64], index: 7, kind: input, shape index: {}]   ;;  %s1998_s8 = inlined_call_operand.vmem [shape: f32[1,64], index: 8, kind: input, shape index: {}]   ;;  %s1999_s9 = inlined_call_operand.vmem [shape: bf16[64,128], index: 9, kind: input, shape index: {}]   ;;  %s2000_s10 = inlined_call_operand.vmem [shape: f32[1,128], index: 10, kind: input, shape index: {}]   ;;  %s2001_s11 = inlined_call_operand.hbm [shape: f32[24,128], index: 11, kind: output, shape index: {}]  }
   0x1   :  { %18 = vsyncpa [#allocation3 + $0x1], 0  ;;  %s1548_s17 = smov 0   ;;  %s1550_s18 = smov 0  }
   0x2   :  { %s1552_s19 = smov 0   ;;  %s1554_s20 = smov 0  }
   0x3 LB: > { %s1569_s21 = sadd.s32 4294967295, %s1480_s20   ;;  %s1174_s22 = sadd.s32 4294967294, %s1480_s20   ;;  %s1480_s20 = sphi %s1554_s20, %s2009_s20   ;;  %s1476_s19 = sphi %s1552_s19, %s2008_s19   ;;  %s1472_s18 = sphi %s1550_s18, %s2007_s18   ;;  %s1468_s17 = sphi %s1548_s17, %s2006_s17  }
   0x4   : > { %s1573_s23 = sadd.s32 1, %s1480_s20   ;;  %s267_s24 = sadd.s32 1, %s1476_s19 }
   0x5   : > { %s264_s25 = ssub.s32 %s1480_s20, %s1573_s23  ;;  %p277_p0 = scmp.ne.s32.totalorder %s1476_s19, %s1472_s18 }
   0x6   : > { %p265_p1 = scmp.eq.s32.totalorder %s264_s25, 0  ;;  %p278_p2 = scmp.eq.s32.totalorder %s1569_s21, 1 }
   0x7   : > { %p283_p3 = scmp.ne.s32.totalorder %s1472_s18, %s1468_s17  ;;  %p284_p4 = scmp.eq.s32.totalorder %s1174_s22, 1 }
   0x8   : > { %s1584_s26 = scalar_select %p265_p1, %s1476_s19, %s267_s24  }
   0x9   : > { %p1586_p5 = por %p278_p2, %p277_p0  ;;  %p1590_p6 = por %p284_p4, %p283_p3 }
   0xa   : > { %2002 = sst [smem:[#allocation5_spill]] %s1584_s26  ;;  %p1177_p7 = scmp.ge.s32.totalorder %s1480_s20, 1 }
   0xb   : > { %p349_p8 = scmp.lt.s32.totalorder %s1480_s20, 3 }
   0xd   : > { %p350_p9 = pnand %p1177_p7, %p349_p8 }
   0xe   : > { %s1597_s29 = sshll.u32 (!%p350_p9), %s1569_s21, 1  ;;  %v1610_v1 = vld [vmem:[%s1993_s3 + $0x4] ss:$8 sps:$4 sm:$0xff] (!%p350_p9)   ;;  %v1615_v2 = vld [vmem:[%s1993_s3] ss:$8 sps:$4 sm:$0xff] (!%p350_p9)   ;;  %v1482_v16 = vmov (!%p350_p9), 0   ;;  %v505_v32 = vlaneseq (!%p350_p9) }
   0xf   : > { %353 = sbr.rel (%p350_p9) target bundleno = 1951 (0x79f), region = 64  ;;  %p398_p10 = scmp.lt.s32.totalorder (!%p350_p9), %s1597_s29, 2  ;;  %v1620_v3 = vld [vmem:[%s1993_s3 + $0x14] ss:$8 sps:$4 sm:$0xff] (!%p350_p9)   ;;  %595 = vmatprep.subr.bf16.mxu0 (!%p350_p9), %v1610_v1  ;;  %v1627_v4 = vld [vmem:[%s1993_s3 + $0x10] ss:$8 sps:$4 sm:$0xff] (!%p350_p9)   ;;  %627 = vmatprep.mubr.bf16.mxu0 (!%p350_p9), %v1482_v16 }
  0x10   : > { %596 = vmatpush1.bf16.msra.mxu0 (!%p350_p9), %v1615_v2  ;;  %v1633_v5 = vld [vmem:[%s1993_s3 + $0x24] ss:$8 sps:$4 sm:$0xff] (!%p350_p9)   ;;  %v1640_v10 = vld [vmem:[%s1993_s3 + $0x20] ss:$8 sps:$4 sm:$0xff] (!%p350_p9)   ;;  %v1646_v11 = vld [vmem:[%s1993_s3 + $0x34] ss:$8 sps:$4 sm:$0xff] (!%p350_p9)  }
  0x11   : > { %597 = vmatprep.subr.bf16.mxu0 (!%p350_p9), %v1620_v3  ;;  %v1651_v12 = vld [vmem:[%s1993_s3 + $0x30] ss:$8 sps:$4 sm:$0xff] (!%p350_p9)   ;;  %v1658_v13 = vld [vmem:[%s1993_s3 + $0x44] ss:$8 sps:$4 sm:$0xff] (!%p350_p9)   ;;  %v1663_v14 = vld [vmem:[%s1993_s3 + $0x40] ss:$8 sps:$4 sm:$0xff] (!%p350_p9)  }
  0x12   : > { %v1668_v15 = vld [vmem:[%s1993_s3 + $0x54] ss:$8 sps:$4 sm:$0xff] (!%p350_p9)   ;;  %v1676_v17 = vld [vmem:[%s1993_s3 + $0x50] ss:$8 sps:$4 sm:$0xff] (!%p350_p9)   ;;  %v1682_v18 = vld [vmem:[%s1993_s3 + $0x64] ss:$8 sps:$4 sm:$0xff] (!%p350_p9)  }
  0x13   : > { %v1688_v19 = vld [vmem:[%s1993_s3 + $0x60] ss:$8 sps:$4 sm:$0xff] (!%p350_p9)   ;;  %v1694_v20 = vld [vmem:[%s1993_s3 + $0x74] ss:$8 sps:$4 sm:$0xff] (!%p350_p9)   ;;  %v1700_v21 = vld [vmem:[%s1993_s3 + $0x70] ss:$8 sps:$4 sm:$0xff] (!%p350_p9)  }
  0x14   : > { %598 = vmatpush1.bf16.msra.mxu0 (!%p350_p9), %v1627_v4  ;;  %v1707_v26 = vld [vmem:[%s1991_s1] ss:$0 sm:$0xff] (!%p350_p9)  ;;  %v506_v33 = vshrl.u32 (!%p350_p9), %v505_v32, 7  ;;  %v1745_v59 = vld [vmem:[%s1997_s7 + $0x48] sm:$0xff] (!%p350_p9)   ;;  %v1758_v61 = vld [vmem:[%s1997_s7 + $0x50] sm:$0xff] (!%p350_p9)   ;;  %vm1484_vm0 = vmmov (!%p350_p9), 0  }
  0x15   : > { %599 = vmatprep.subr.bf16.mxu0 (!%p350_p9), %v1633_v5  ;;  %v1712_v28 = vld [vmem:[%s1992_s2] ss:$0 sm:$0xff] (!%p350_p9)  ;;  %v1752_v60 = vld [vmem:[%s1997_s7 + $0x8] sm:$0xff] (!%p350_p9)   ;;  %vm869_vm1 = vcmask (!%p350_p9), 523264  }
  0x16   : > { %s399_s30 = scalar_select %p398_p10, %s1597_s29, 2  ;;  %v1716_v34 = vsub.s32 0, %v506_v33  ;;  %v417_v35 = vld [vmem:[%s1994_s4] sm:$0x3]  ;;  %v1721_v36 = vsub.s32 1, %v506_v33  ;;  %v1797_v33 = vld [vmem:[%s1997_s7 + $0x68] sm:$0xff]  }
  0x17   : > { %v1735_v57 = vld [vmem:[%s1997_s7 + $0x40] sm:$0xff]   ;;  %s1101_s25 = ssub.s32 (%p1586_p5), 3, %s1597_s29 }
  0x18   : > { %s1180_s12 = sshll.u32 %s399_s30, 3  ;;  %600 = vmatpush1.bf16.msra.mxu0 %v1640_v10  ;;  %v1724_v37 = vrot.slane %v417_v35, %v1716_v34  ;;  %v1727_v38 = vrot.slane %v417_v35, %v1721_v36  ;;  %v1740_v58 = vld [vmem:[%s1997_s7] sm:$0xff]   ;;  %1233 = vmatprep.subr.bf16.mxu1 %v1735_v57  ;;  %v1804_v35 = vld [vmem:[%s1997_s7 + $0x28] sm:$0xff]   ;;  %p1102_p11 = scmp.lt.s32.totalorder (%p1586_p5), %s1101_s25, 2 }
  0x19   : > { %s1604_s15 = scalar_lea.vmem %s1990_s0, %s1180_s12  ;;  %601 = vmatprep.subr.bf16.mxu0 %v1646_v11  ;;  %1234 = vmatpush3.bf16.msra.mxu1 %v1740_v58  ;;  %v1792_v32 = vld [vmem:[%s1997_s7 + $0x20] sm:$0xff]  }
  0x1a   : > { %v476_v0 = vld [vmem:[%s1604_s15] sm:$0xff]  ;;  %v914_v56 = vld [vmem:[%s1604_s15 + $0x8] sm:$0xff]  ;;  %1235 = vmatprep.subr.bf16.mxu1 %v1745_v59  ;;  %s390_s15 = sand.u32 1, %s1472_s18  }
  0x1b   : > { %477 = vadd.xlane.f32.xlu0 %v476_v0  ;;  %s1178_s14 = sshll.u32 %s390_s15, 4  ;;  %s1929_s24 = scalar_lea.sflag [#allocation3], %s390_s15 }
  0x1c   : > { %602 = vmatpush1.bf16.msra.mxu0 %v1651_v12  ;;  %s1917_s22 = scalar_lea.vmem [#allocation2], %s1178_s14 }
  0x1d   : > { %603 = vmatprep.subr.bf16.mxu0 %v1658_v13  ;;  %1236 = vmatpush3.bf16.msra.mxu1 %v1752_v60 }
  0x1e   : > { %1237 = vmatprep.subr.bf16.mxu1 %v1758_v61 }
  0x20   : > { %604 = vmatpush1.bf16.msra.mxu0 %v1663_v14 }
  0x21   : > { %605 = vmatprep.subr.bf16.mxu0 %v1668_v15 }
  0x24   : > { %606 = vmatpush1.bf16.msra.mxu0 %v1676_v17 }
  0x25   : > { %607 = vmatprep.subr.bf16.mxu0 %v1682_v18 }
  0x28   : > { %608 = vmatpush1.bf16.msra.mxu0 %v1688_v19 }
  0x29   : > { %609 = vmatprep.subr.bf16.mxu0 %v1694_v20 }
  0x2c   : > { %610 = vmatpush1.bf16.msra.mxu0 %v1700_v21 }
  0xa8   : > { %v478_v6 = vpop.xlane.xlu0 %477 }
  0xa9   : > { %v480_v7 = vmul.f32 0.0078125, %v478_v6 }
  0xab   : > { %v481_v8 = vsub.f32 %v476_v0, %v480_v7 }
  0xad   : > { %v482_v9 = vmul.f32 %v481_v8, %v481_v8 }
  0xaf   : > { %483 = vadd.xlane.f32.xlu0 %v482_v9 }
 0x13c   : > { %v484_v22 = vpop.xlane.xlu0 %483 }
 0x13d   : > { %v485_v23 = vmul.f32 0.0078125, %v484_v22 }
 0x13f   : > { %v486_v24 = vadd.f32 1e-05, %v485_v23 }
 0x141   : > { %1398 = vrsqrt.f32 %v486_v24 }
 0x14b   : > { %v1399_v25 = vpop.eup %1398 }
 0x14c   : > { %v488_v27 = vmul.f32 %v1399_v25, %v481_v8 }
 0x14e   : > { %v495_v29 = vmul.f32 %v1707_v26, %v488_v27  ;;  %v1769_v27 = vld [vmem:[%s1997_s7 + $0x10] sm:$0xff]  }
 0x14f   : > { %1238 = vmatpush3.bf16.msra.mxu1 %v1769_v27 }
 0x150   : > { %v502_v30 = vadd.f32 %v1712_v28, %v495_v29  ;;  %v1775_v29 = vld [vmem:[%s1997_s7 + $0x58] sm:$0xff]  }
 0x151   : > { %1239 = vmatprep.subr.bf16.mxu1 %v1775_v29 }
 0x152   : > { %v503_v31 = vpack.c.bf16 %v502_v30, %v502_v30  ;;  %v1780_v30 = vld [vmem:[%s1997_s7 + $0x18] sm:$0xff]  }
 0x153   : > { %1240 = vmatpush3.bf16.msra.mxu1 %v1780_v30 }
 0x154   : > { %628 = vmatmul.mubr.bf16.vlgmr.msra.gmra.mrb[0].mxu0 %v503_v31  ;;  %v1787_v31 = vld [vmem:[%s1997_s7 + $0x60] sm:$0xff]  }
 0x155   : > { %1241 = vmatprep.subr.bf16.mxu1 %v1787_v31 }
 0x157   : > { %1242 = vmatpush3.bf16.msra.mxu1 %v1792_v32 }
 0x158   : > { %1243 = vmatprep.subr.bf16.mxu1 %v1797_v33 }
 0x15b   : > { %1244 = vmatpush3.bf16.msra.mxu1 %v1804_v35 }
 0x227   : > { %v629_v39 = vpop.f32.mrb[0].mxu0 }
 0x228   : > { %v630_v40 = vadd.f32 %v629_v39, %v1724_v37  ;;  %v631_v41 = vpop.f32.mrb[1].mxu0  ;;  %v1810_v39 = vld [vmem:[%s1997_s7 + $0x70] sm:$0xff]  }
 0x229   : > { %v632_v42 = vadd.f32 %v631_v41, %v1727_v38  ;;  %v633_v43 = vpop.f32.mrb[2].mxu0  ;;  %1245 = vmatprep.subr.bf16.mxu1 %v1810_v39  ;;  %v1822_v41 = vld [vmem:[%s1997_s7 + $0x78] sm:$0xff]  }
 0x22a   : > { %v638_v44 = vmul.f32 0.70710677, %v630_v40  ;;  %v634_v45 = vpop.f32.mrb[3].mxu0  ;;  %v636_v49 = vmul.f32 0.5, %v630_v40  ;;  %v1816_v40 = vld [vmem:[%s1997_s7 + $0x30] sm:$0xff]  }
 0x22b   : > { %v639_v46 = vmul.f32 0.70710677, %v632_v42  ;;  %v637_v51 = vmul.f32 0.5, %v632_v42  ;;  %1246 = vmatpush3.bf16.msra.mxu1 %v1816_v40  ;;  %v1828_v42 = vld [vmem:[%s1997_s7 + $0x38] sm:$0xff]  }
 0x22c   : > { %1400 = verf.f32 %v638_v44  ;;  %1247 = vmatprep.subr.bf16.mxu1 %v1822_v41 }
 0x22d   : > { %1402 = verf.f32 %v639_v46  ;;  %v415_v46 = vld [vmem:[%s1995_s5] sm:$0x3] }
 0x22f   : > { %1248 = vmatpush3.bf16.msra.mxu1 %v1828_v42 }
 0x230   : > { %929 = vmatprep.subr.bf16.mxu1 %v1610_v1 }
 0x236   : > { %v1401_v47 = vpop.eup %1400 }
 0x237   : > { %v1403_v48 = vpop.eup %1402  ;;  %v642_v50 = vadd.f32 1.0, %v1401_v47  ;;  %v416_v47 = vld [vmem:[%s1996_s6] sm:$0x3] }
 0x238   : > { %v643_v52 = vadd.f32 1.0, %v1403_v48  ;;  %v1840_v48 = vrot.slane %v415_v46, %v1716_v34 }
 0x239   : > { %v644_v53 = vmul.f32 %v642_v50, %v636_v49  ;;  %v1843_v49 = vrot.slane %v415_v46, %v1721_v36 }
 0x23a   : > { %v645_v54 = vmul.f32 %v643_v52, %v637_v51  ;;  %v1846_v51 = vrot.slane %v416_v47, %v1716_v34  ;;  %v1849_v52 = vrot.slane %v416_v47, %v1721_v36 }
 0x23c   : > { %v646_v55 = vadd.f32 %v645_v54, %v644_v53 }
 0x23e   : > { %647 = vadd.xlane.f32.xlu1 %v646_v55 }
 0x242   : > { %915 = vadd.xlane.f32.xlu1 %v914_v56 }
 0x2cb   : > { %v648_v62 = vpop.xlane.xlu1 %647 }
 0x2cc   : > { %v650_v63 = vmul.f32 0.00390625, %v648_v62 }
 0x2ce   : > { %v651_v0 = vsub.f32 %v644_v53, %v650_v63  ;;  %v652_v6 = vsub.f32 %v645_v54, %v650_v63 }
 0x2cf   : > { %v916_v7 = vpop.xlane.xlu1 %915 }
 0x2d0   : > { %v917_v8 = vmul.f32 0.0078125, %v916_v7  ;;  %v653_v9 = vmul.f32 %v651_v0, %v651_v0  ;;  %v654_v22 = vmul.f32 %v652_v6, %v652_v6 }
 0x2d2   : > { %v1762_v23 = vsub.f32 %v914_v56, %v917_v8  ;;  %v655_v24 = vadd.f32 %v654_v22, %v653_v9 }
 0x2d4   : > { %656 = vadd.xlane.f32.xlu0 %v655_v24  ;;  %v919_v25 = vmul.f32 %v1762_v23, %v1762_v23 }
 0x2d6   : > { %920 = vadd.xlane.f32.xlu1 %v919_v25 }
 0x361   : > { %v657_v43 = vpop.xlane.xlu0 %656 }
 0x362   : > { %v658_v44 = vmul.f32 0.00390625, %v657_v43 }
 0x363   : > { %v921_v56 = vpop.xlane.xlu1 %920 }
 0x364   : > { %v659_v45 = vadd.f32 1e-05, %v658_v44  ;;  %v922_v7 = vmul.f32 0.0078125, %v921_v56 }
 0x366   : > { %1404 = vrsqrt.f32 %v659_v45  ;;  %v923_v34 = vadd.f32 1e-05, %v922_v7 }
 0x368   : > { %1406 = vrsqrt.f32 %v923_v34 }
 0x370   : > { %v1405_v50 = vpop.eup %1404 }
 0x371   : > { %v662_v1 = vmul.f32 %v1405_v50, %v652_v6  ;;  %v661_v53 = vmul.f32 %v1405_v50, %v651_v0 }
 0x372   : > { %v1407_v36 = vpop.eup %1406 }
 0x373   : > { %v675_v54 = vmul.f32 %v1843_v49, %v662_v1  ;;  %v674_v55 = vmul.f32 %v1840_v48, %v661_v53 }
 0x375   : > { %v688_v62 = vadd.f32 %v1849_v52, %v675_v54  ;;  %v687_v63 = vadd.f32 %v1846_v51, %v674_v55 }
 0x377   : > { %v690_v8 = vpack.c.bf16 %v688_v62, %v688_v62  ;;  %v689_v9 = vpack.c.bf16 %v687_v63, %v687_v63 }
 0x379   : > { %825 = vmatprep.mubr.bf16.mxu1 %v690_v8 }
 0x37a   : > { %826 = vmatmul.mubr.bf16.vlgmr.msra.gmra.mrb[0].mxu1 %v689_v9 }
 0x37b   : > { %930 = vmatpush1.bf16.msra.mxu1 %v1615_v2  ;;  %961 = vmatprep.mubr.bf16.mxu1 %v1482_v16  ;;  %v925_v2 = vmul.f32 %v1407_v36, %v1762_v23  ;;  %v1890_v16 = vld [vmem:[%s1998_s8] ss:$0 sm:$0xff] }
 0x37c   : > { %931 = vmatprep.subr.bf16.mxu1 %v1620_v3 }
 0x37d   : > { %v926_v3 = vmul.f32 %v1707_v26, %v925_v2 }
 0x37f   : > { %932 = vmatpush1.bf16.msra.mxu1 %v1627_v4  ;;  %v927_v4 = vadd.f32 %v1712_v28, %v926_v3 }
 0x380   : > { %933 = vmatprep.subr.bf16.mxu1 %v1633_v5 }
 0x381   : > { %v928_v5 = vpack.c.bf16 %v927_v4, %v927_v4 }
 0x383   : > { %934 = vmatpush1.bf16.msra.mxu1 %v1640_v10  ;;  %v1394_v10 = vld [vmem:[%s1999_s9] sm:$0xff]  }
 0x384   : > { %935 = vmatprep.subr.bf16.mxu1 %v1646_v11  ;;  %v1483_v11 = vmov 0.0  }
 0x385   : > { %1287 = vmatprep.subr.bf16.mxu0 %v1483_v11  ;;  %1295 = vmatprep.mubr.msk.bf16.mxu0 %vm1484_vm0, %v1483_v11 }
 0x386   : > { %1288 = vmatpush3.bf16.msra.mxu0 %v1394_v10 }
 0x387   : > { %936 = vmatpush1.bf16.msra.mxu1 %v1651_v12  ;;  %1289 = vmatprep.subr.bf16.mxu0 %v1483_v11  ;;  %v1395_v12 = vld [vmem:[%s1999_s9 + $0x8] sm:$0xff]  }
 0x388   : > { %937 = vmatprep.subr.bf16.mxu1 %v1658_v13  ;;  %v1396_v13 = vld [vmem:[%s1999_s9 + $0x10] sm:$0xff]  }
 0x38a   : > { %1290 = vmatpush3.bf16.msra.mxu0 %v1395_v12 }
 0x38b   : > { %938 = vmatpush1.bf16.msra.mxu1 %v1663_v14  ;;  %1291 = vmatprep.subr.bf16.mxu0 %v1483_v11  ;;  %v1397_v14 = vld [vmem:[%s1999_s9 + $0x18] sm:$0xff]  }
 0x38c   : > { %939 = vmatprep.subr.bf16.mxu1 %v1668_v15 }
 0x38e   : > { %1292 = vmatpush3.bf16.msra.mxu0 %v1396_v13 }
 0x38f   : > { %940 = vmatpush1.bf16.msra.mxu1 %v1676_v17  ;;  %1293 = vmatprep.subr.bf16.mxu0 %v1483_v11 }
 0x390   : > { %941 = vmatprep.subr.bf16.mxu1 %v1682_v18 }
 0x392   : > { %1294 = vmatpush3.bf16.msra.mxu0 %v1397_v14 }
 0x393   : > { %942 = vmatpush1.bf16.msra.mxu1 %v1688_v19  ;;  %1260 = vmatprep.subr.bf16.mxu0 %v1735_v57 }
 0x394   : > { %943 = vmatprep.subr.bf16.mxu1 %v1694_v20 }
 0x397   : > { %944 = vmatpush1.bf16.msra.mxu1 %v1700_v21 }
 0x398   : > { %1299 = vmatprep.subr.bf16.mxu1 %v1483_v11 }
 0x39a   : > { %962 = vmatmul.mubr.bf16.vlgmr.msra.gmra.mrb[4].mxu1 %v928_v5 }
 0x39b   : > { %1300 = vmatpush3.bf16.msra.mxu1 %v1394_v10  ;;  %1307 = vmatprep.mubr.msk.bf16.mxu1 %vm1484_vm0, %v1483_v11 }
 0x39c   : > { %1301 = vmatprep.subr.bf16.mxu1 %v1483_v11 }
 0x39f   : > { %1302 = vmatpush3.bf16.msra.mxu1 %v1395_v12 }
 0x3a0   : > { %1303 = vmatprep.subr.bf16.mxu1 %v1483_v11 }
 0x3a3   : > { %1304 = vmatpush3.bf16.msra.mxu1 %v1396_v13 }
 0x3a4   : > { %1305 = vmatprep.subr.bf16.mxu1 %v1483_v11 }
 0x3a7   : > { %1306 = vmatpush3.bf16.msra.mxu1 %v1397_v14 }
 0x44d   : > { %v1249_v15 = vpop.f32.mrb[0].mxu1 }
 0x44e   : > { %v1250_v17 = vpop.f32.mrb[1].mxu1 }
 0x44f   : > { %v1251_v18 = vadd.f32 %v1250_v17, %v1249_v15  ;;  %v1252_v19 = vpop.f32.mrb[2].mxu1 }
 0x450   : > { %v1253_v20 = vpop.f32.mrb[3].mxu1 }
 0x451   : > { %v828_v21 = vadd.f32 %v1251_v18, %v1890_v16 }
 0x453   : > { %v834_v26 = vmul.f32 0.70710677, %v828_v21  ;;  %v833_v0 = vmul.f32 0.5, %v828_v21 }
 0x455   : > { %1408 = verf.f32 %v834_v26 }
 0x45f   : > { %v1409_v28 = vpop.eup %1408 }
 0x460   : > { %v836_v6 = vadd.f32 1.0, %v1409_v28 }
 0x462   : > { %v837_v22 = vmul.f32 %v836_v6, %v833_v0 }
 0x464   : > { %v838_v57 = vpack.c.bf16 %v837_v22, %v837_v22 }
 0x466   : > { %1296 = vmatmul.mubr.msk.bf16.vlgmr.msra.gmra.mrb[4].mxu0 %vm869_vm1, %v838_v57 }
 0x467   : > { %1261 = vmatpush3.bf16.msra.mxu0 %v1740_v58 }
 0x468   : > { %1262 = vmatprep.subr.bf16.mxu0 %v1745_v59 }
 0x46b   : > { %1263 = vmatpush3.bf16.msra.mxu0 %v1752_v60 }
 0x46c   : > { %1264 = vmatprep.subr.bf16.mxu0 %v1758_v61 }
 0x46d   : > { %v963_v23 = vpop.f32.mrb[4].mxu1 }
 0x46e   : > { %v964_v24 = vadd.f32 %v963_v23, %v1724_v37  ;;  %v965_v25 = vpop.f32.mrb[5].mxu1 }
 0x46f   : > { %v966_v43 = vadd.f32 %v965_v25, %v1727_v38  ;;  %v967_v44 = vpop.f32.mrb[6].mxu1  ;;  %1265 = vmatpush3.bf16.msra.mxu0 %v1769_v27 }
 0x470   : > { %v972_v45 = vmul.f32 0.70710677, %v964_v24  ;;  %v968_v46 = vpop.f32.mrb[7].mxu1  ;;  %1266 = vmatprep.subr.bf16.mxu0 %v1775_v29  ;;  %v970_v59 = vmul.f32 0.5, %v964_v24 }
 0x471   : > { %v973_v58 = vmul.f32 0.70710677, %v966_v43  ;;  %v971_v61 = vmul.f32 0.5, %v966_v43 }
 0x472   : > { %1410 = verf.f32 %v972_v45 }
 0x473   : > { %1412 = verf.f32 %v973_v58  ;;  %1267 = vmatpush3.bf16.msra.mxu0 %v1780_v30 }
 0x474   : > { %1268 = vmatprep.subr.bf16.mxu0 %v1787_v31 }
 0x477   : > { %1269 = vmatpush3.bf16.msra.mxu0 %v1792_v32 }
 0x478   : > { %1270 = vmatprep.subr.bf16.mxu0 %v1797_v33 }
 0x47b   : > { %1271 = vmatpush3.bf16.msra.mxu0 %v1804_v35 }
 0x47c   : > { %v1411_v37 = vpop.eup %1410  ;;  %1272 = vmatprep.subr.bf16.mxu0 %v1810_v39 }
 0x47d   : > { %v1413_v38 = vpop.eup %1412  ;;  %v976_v60 = vadd.f32 1.0, %v1411_v37 }
 0x47e   : > { %v977_v27 = vadd.f32 1.0, %v1413_v38 }
 0x47f   : > { %v978_v29 = vmul.f32 %v976_v60, %v970_v59  ;;  %1273 = vmatpush3.bf16.msra.mxu0 %v1816_v40  ;;  %v1216_v40 = vld [vmem:[%s2000_s10] ss:$0 sm:$0xff] }
 0x480   : > { %v979_v30 = vmul.f32 %v977_v27, %v971_v61  ;;  %1274 = vmatprep.subr.bf16.mxu0 %v1822_v41 }
 0x482   : > { %v980_v31 = vadd.f32 %v979_v30, %v978_v29 }
 0x483   : > { %1275 = vmatpush3.bf16.msra.mxu0 %v1828_v42 }
 0x484   : > { %981 = vadd.xlane.f32.xlu0 %v980_v31 }
 0x511   : > { %v982_v32 = vpop.xlane.xlu0 %981 }
 0x512   : > { %v983_v33 = vmul.f32 0.00390625, %v982_v32 }
 0x514   : > { %v984_v35 = vsub.f32 %v978_v29, %v983_v33  ;;  %v985_v39 = vsub.f32 %v979_v30, %v983_v33 }
 0x516   : > { %v986_v47 = vmul.f32 %v984_v35, %v984_v35  ;;  %v987_v50 = vmul.f32 %v985_v39, %v985_v39 }
 0x518   : > { %v988_v1 = vadd.f32 %v987_v50, %v986_v47 }
 0x51a   : > { %989 = vadd.xlane.f32.xlu1 %v988_v1 }
 0x539   : > { %v907_v41 = vpop.f32.mrb[4].mxu0 }
 0x53a   : > { %v908_v53 = vadd.f32 %v1216_v40, %v907_v41  ;;  %v1297_v54 = vpop.f32.mrb[5].mxu0 }
 0x53b   : > { %v910_v42 = vpop.f32.mrb[6].mxu0 }
 0x53c   : > { %913 = vst [vmem:[%s1917_s22] sm:$0xff] %v908_v53  ;;  %v1298_v55 = vpop.f32.mrb[7].mxu0 }
 0x5a7   : > { %v990_v56 = vpop.xlane.xlu1 %989 }
 0x5a8   : > { %v991_v62 = vmul.f32 0.00390625, %v990_v56 }
 0x5aa   : > { %v992_v63 = vadd.f32 1e-05, %v991_v62 }
 0x5ac   : > { %1414 = vrsqrt.f32 %v992_v63 }
 0x5b6   : > { %v1415_v7 = vpop.eup %1414 }
 0x5b7   : > { %v994_v8 = vmul.f32 %v1415_v7, %v984_v35  ;;  %v995_v9 = vmul.f32 %v1415_v7, %v985_v39 }
 0x5b9   : > { %v997_v34 = vmul.f32 %v995_v9, %v1843_v49  ;;  %v996_v36 = vmul.f32 %v994_v8, %v1840_v48 }
 0x5bb   : > { %v999_v2 = vadd.f32 %v997_v34, %v1849_v52  ;;  %v998_v3 = vadd.f32 %v996_v36, %v1846_v51 }
 0x5bd   : > { %v1001_v4 = vpack.c.bf16 %v999_v2, %v999_v2  ;;  %v1000_v5 = vpack.c.bf16 %v998_v3, %v998_v3 }
 0x5bf   : > { %1034 = vmatprep.mubr.bf16.mxu0 %v1001_v4 }
 0x5c0   : > { %1035 = vmatmul.mubr.bf16.vlgmr.msra.gmra.mrb[8].mxu0 %v1000_v5 }
 0x693   : > { %v1276_v10 = vpop.f32.mrb[8].mxu0 }
 0x694   : > { %v1277_v11 = vpop.f32.mrb[9].mxu0 }
 0x695   : > { %v1278_v12 = vadd.f32 %v1277_v11, %v1276_v10  ;;  %v1279_v13 = vpop.f32.mrb[10].mxu0 }
 0x696   : > { %v1280_v14 = vpop.f32.mrb[11].mxu0 }
 0x697   : > { %v1037_v15 = vadd.f32 %v1278_v12, %v1890_v16 }
 0x699   : > { %v1043_v49 = vmul.f32 0.70710677, %v1037_v15  ;;  %v1042_v17 = vmul.f32 0.5, %v1037_v15 }
 0x69b   : > { %1416 = verf.f32 %v1043_v49 }
 0x6a5   : > { %v1417_v48 = vpop.eup %1416 }
 0x6a6   : > { %v1045_v52 = vadd.f32 1.0, %v1417_v48 }
 0x6a8   : > { %v1046_v18 = vmul.f32 %v1045_v52, %v1042_v17 }
 0x6aa   : > { %v1047_v51 = vpack.c.bf16 %v1046_v18, %v1046_v18 }
 0x6ac   : > { %1308 = vmatmul.mubr.msk.bf16.vlgmr.msra.gmra.mrb[8].mxu1 %vm869_vm1, %v1047_v51 }
 0x77c   : > { %1099 = sbr.rel (!%p1586_p5) target bundleno = 1951 (0x79f), region = 68 }
 0x77f   : > { %v1085_v19 = vpop.f32.mrb[8].mxu1 }
 0x780   : > { %v1086_v20 = vadd.f32 %v1216_v40, %v1085_v19  ;;  %v1309_v21 = vpop.f32.mrb[9].mxu1 }
 0x781   : > { %v1088_v26 = vpop.f32.mrb[10].mxu1 }
 0x782   : > { %1091 = vst [vmem:[%s1917_s22 + $0x8] sm:$0xff] %v1086_v20  ;;  %v1310_v28 = vpop.f32.mrb[11].mxu1 }
 0x783   : > { %s2011_s25 = smov (!%p1102_p11, %s1101_s25), 2 }
 0x784   : > { %s1934_s30 = sshll.u32 %s2011_s25, 7 }
 0x785   : > { %s1106_s12 = ssub.s32 256, %s1934_s30 }
 0x786   : > { %1107 = vsyncadd %s1929_s24, %s1106_s12  ;;  %p1226_p12 = scmp.ne.s32.totalorder %s1934_s30, 0  ;;  %s1232_s13 = sshll.u32 %s1569_s21, 8 }
 0x787   : > { %s1943_s14 = scalar_lea.hbm %s2001_s11, %s1232_s13  ;;  %s1112_s29 = sshll.u32 %s1917_s22, 4  ;;  %s1946_s29 = int_to_ptr.vmem [resolvable:$true] %s1112_s29 }
 0x788   : > { %s1418_s16 = scalar_lea.vmem %s1946_s29, %s1934_s30  ;;  %s1485_s26 = smov [#allocation2]  }
 0x789   : > { %p1419_p13 = scmp.ne.s32.totalorder %s1946_s29, %s1418_s16  ;;  %s1422_s25 = sshll.u32 %s1485_s26, 4  ;;  %s1423_s25 = int_to_ptr.vmem [resolvable:$false] %s1422_s25 }
 0x78a   : > { %s1424_s21 = scalar_lea.vmem %s1423_s25, 512  ;;  %p1425_p2 = scmp.lt.s32.totalorder %s1946_s29, %s1423_s25 }
 0x78b   : > { %p1420_p0 = pnand %p1419_p13, %p1226_p12  ;;  %p1426_p3 = scmp.lt.s32.totalorder %s1424_s21, %s1418_s16 }
 0x78d   : > { %p1421_p1 = pneg %p1420_p0  ;;  %p1427_p4 = por %p1426_p3, %p1425_p2 }
 0x78f   : > { %p1428_p5 = pnand %p1427_p4, %p1421_p1 }
 0x791   : > { %1431 = shalt.err (!%p1428_p5)
}
 0x792   : > { %s1432_s22 = scalar_lea.hbm %s1943_s14, %s1934_s30  ;;  %s1436_s15 = scalar_lea.hbm %s2001_s11, 384 }
 0x793   : > { %p1433_p7 = scmp.ne.s32.totalorder %s1943_s14, %s1432_s22  ;;  %p1437_p10 = scmp.lt.u32.totalorder %s1943_s14, %s2001_s11 }
 0x794   : > { %p1438_p11 = scmp.lt.u32.totalorder %s1436_s15, %s1432_s22  ;;  %p1440_p0 = scmp.lt.u32.totalorder %s1432_s22, %s1943_s14 }
 0x795   : > { %p1434_p8 = pnand %p1433_p7, %p1226_p12 }
 0x796   : > { %p1439_p13 = por %p1438_p11, %p1437_p10 }
 0x797   : > { %p1435_p9 = pneg %p1434_p8 }
 0x798   : > { %p1441_p1 = por %p1440_p0, %p1439_p13 }
 0x79a   : > { %p1442_p2 = pnand %p1441_p1, %p1435_p9 }
 0x79c   : > { %1445 = shalt.err (!%p1442_p2)
}
 0x79d   : > { %s1486_s26 = smov 128   ;;  %s1487_s25 = smov 8  }
 0x79e   : > { %1118 = dma.vmem_to_hbm [thread:$0]  (%p1226_p12), %s1946_s29, %s1934_s30, %s1943_s14, %s1929_s24, %s1486_s26, %s1486_s26, %s1487_s25  }
 0x79f PF: > { %p1316_p3 = scmp.ge.s32.totalorder %s1480_s20, 2  ;;  %s1127_s21 = sand.u32 1, %s1468_s17  }
 0x7a0   : > { %s1128_s22 = scalar_lea.sflag [#allocation3], %s1127_s21 }
 0x7a1   : > { %p1313_p4 = pnand %p1316_p3, %p1590_p6 }
 0x7a3   : > { %1463 = dma.done.wait (!%p1313_p4), %s1128_s22, 256  }
 0x7a4   : > { %1465 = vsyncadd (!%p1313_p4), %s1128_s22, 4294967040  ;;  %s2005_s12 = sld [smem:[#allocation5_spill]]  ;;  %p21_p5 = scmp.ge.s32.totalorder %s1573_s23, 4  }
 0x7a5   : > { %s2006_s17 = smov %s1472_s18  ;;  %s2007_s18 = smov %s1476_s19 }
 0x7a6   : > { %s2009_s20 = smov %s1573_s23  ;;  %23 = sbr.rel (!%p21_p5) target bundleno = 3 (0x3), region = 99 }
 0x7aa   : > { %s2008_s19 = smov %s2005_s12 }
 0x7ad   :  { %1133 = vsyncpa [#allocation3], 1 }
 0x7ae   :  { %1135 = vsyncpa [#allocation3 + $0x1], 1 }

</bundles_post_ra>
